<compile_context>
chip_gen: v6e
topology: v6e:2x2x1
jax: 0.10.0
libtpu: 0.0.40
codegen_flags: <defaults>
</compile_context>

<pallas_src>
import jax
import jax.numpy as jnp
from jax.experimental import pallas as pl
from jax.experimental.pallas import tpu as pltpu


def _expand_dma_kernel(x_hbm, o_hbm, sem):
    # Pure HBM->HBM identity copy of the whole array via the DMA engine.
    # No VMEM staging, no vreg traffic: the TensorCore only issues the DMA
    # descriptor and waits on the completion semaphore.
    cp = pltpu.make_async_copy(x_hbm, o_hbm, sem)
    cp.start()
    cp.wait()


def expand_forward(x, hidden_nc, height, width, *, materialize=False):
    """Pallas/JAX implementation of Expand.forward.

    x: any tensor whose elements reshape to (-1, hidden_nc, height, width),
       matching torch's input.view(-1, C, H, W).
    returns: (B, hidden_nc, height, width), same dtype as x.

    materialize=False (default): pure-metadata reshape, zero cost — this is
      the faithful equivalent of torch .view and the recommended path.
    materialize=True: routes the bytes through a single HBM->HBM async DMA
      inside a Pallas kernel (fresh output buffer, HBM-roofline copy).
    """
    feat = hidden_nc * height * width
    x_flat = jnp.reshape(x, (-1, feat))
    b = x_flat.shape[0]

    if not materialize:
        # torch .view == zero-copy metadata reshape; no kernel needed.
        return jnp.reshape(x_flat, (b, hidden_nc, height, width))

    itemsize = jnp.dtype(x_flat.dtype).itemsize
    total_bytes = b * feat * itemsize

    flat_out = pl.pallas_call(
        _expand_dma_kernel,
        out_shape=jax.ShapeDtypeStruct((b, feat), x_flat.dtype),
        # Raw HBM refs on both sides: no auto-DMA / VMEM tiling at all.
        in_specs=[pl.BlockSpec(memory_space=pl.ANY)],
        out_specs=pl.BlockSpec(memory_space=pl.ANY),
        scratch_shapes=[pltpu.SemaphoreType.DMA(())],
        # Purely memory-bound custom call: read + write of the whole array.
        cost_estimate=pl.CostEstimate(
            flops=0, transcendentals=0, bytes_accessed=2 * total_bytes
        ),
    )(x_flat)

    # Pure-metadata reshape to NCHW (glue, no compute).
    return jnp.reshape(flat_out, (b, hidden_nc, height, width))


if __name__ == "__main__":
    hidden_nc, height, width = 4, 16, 16
    batch = 2

    key = jax.random.PRNGKey(0)
    x = jax.random.normal(key, (batch, hidden_nc * height * width), dtype=jnp.float32)

    # Reference (torch .view semantics).
    ref = jnp.reshape(x, (-1, hidden_nc, height, width))

    # Default zero-copy path (the faithful .view equivalent).
    out_view = expand_forward(x, hidden_nc, height, width)
    out_view = jax.block_until_ready(out_view)
    assert out_view.shape == (batch, hidden_nc, height, width), out_view.shape
    assert out_view.dtype == x.dtype
    assert bool(jnp.array_equal(out_view, ref))

    # Materializing Pallas path: single HBM->HBM DMA copy.
    out_kernel = expand_forward(x, hidden_nc, height, width, materialize=True)
    out_kernel = jax.block_until_ready(out_kernel)
    assert out_kernel.shape == (batch, hidden_nc, height, width), out_kernel.shape
    assert out_kernel.dtype == x.dtype
    assert bool(jnp.array_equal(out_kernel, ref))

    print("KERNEL_OK")
</pallas_src>

<mosaic_0001>
module attributes {stable_mosaic.version = 11 : i64} {
  func.func @_expand_dma_kernel(%arg0: memref<2x1024xf32, #tpu.memory_space<any>>, %arg1: memref<2x1024xf32, #tpu.memory_space<any>>, %arg2: memref<!tpu.dma_semaphore, #tpu.memory_space<semaphore_mem>>) attributes {dimension_semantics = [], scalar_prefetch = 0 : i64, scratch_operands = 1 : i64, tpu.core_type = #tpu.core_type<tc>} {
    tpu.enqueue_dma source(%arg0 : memref<2x1024xf32, #tpu.memory_space<any>>) target(%arg1 : memref<2x1024xf32, #tpu.memory_space<any>>) target_semaphore(%arg2 : memref<!tpu.dma_semaphore, #tpu.memory_space<semaphore_mem>>)
    tpu.wait_dma2 semaphore(%arg2 : memref<!tpu.dma_semaphore, #tpu.memory_space<semaphore_mem>>) src(%arg0 : memref<2x1024xf32, #tpu.memory_space<any>>) dst(%arg1 : memref<2x1024xf32, #tpu.memory_space<any>>)
    return
  }
}

</mosaic_0001>

<bundles_post_ra>
// kernel: tpu_custom_call.1
= control target key start
LH: loop header
LB: loop body
LE: loop exit
PB: predicated region body
PF: predicated region fallthrough
CT: control target
= control target key end

     0   :  { %s29_s6 = smov [#allocation2]   ;;  %s30_s7 = smov 131072   ;;  %s48_s0 = inlined_call_operand.hbm [shape: f32[2,1024], index: 0, kind: input, shape index: {}]   ;;  %s49_s1 = inlined_call_operand.hbm [shape: f32[2,1024], index: 1, kind: output, shape index: {}]  }
   0x1   :  { %s31_s8 = smov 0  }
   0x2   :  { %12 = dma.general %s48_s0, 256, %s49_s1, %s29_s6, %s30_s7, [#allocation4], %s31_s8, 0  }
   0x3   :  { %27 = dma.done.wait [#allocation2], 256 }
   0x4   :  { %28 = vsyncadd [#allocation2], 4294967040 }
   0x5   :  { %17 = vsyncmov [#allocation2] }
   0x8   :  { %s18_s13 = vpop.sfrf %17 }
   0x9   :  { %p23_p0 = scmp.ne.s32.totalorder %s18_s13, 0 }
   0xb   :  { %22 = shalt.err (%p23_p0)  }

</bundles_post_ra>
